<compile_context>
chip_gen: v5e
topology: v5e:2x2
jax: 0.10.0
libtpu: 0.0.40
codegen_flags: <defaults>
</compile_context>

<pallas_src>
import functools

import jax
import jax.numpy as jnp
from jax.experimental import pallas as pl
from jax.experimental.pallas import tpu as pltpu


def _se_kernel(x_ref, w1_ref, w2_ref, o_ref):
    # x_ref block: (1, C, H*W); weights are full (C_red, C) / (C, C_red) tiles.
    x = x_ref[0].astype(jnp.float32)                      # (C, HW), lane-dense
    inv_hw = jnp.float32(1.0 / x.shape[1])

    # Squeeze: global average pool over the spatial (lane) axis -> (C, 1).
    mean = jnp.sum(x, axis=1, keepdims=True) * inv_hw     # (C, 1)

    # Excite: fc1 (1x1 conv, no bias) -> ReLU -> fc2 -> sigmoid, all on (·, 1) cols.
    h = jnp.dot(w1_ref[...].astype(jnp.float32), mean,
                preferred_element_type=jnp.float32)       # (C_red, 1)
    h = jnp.maximum(h, 0.0)
    g = jnp.dot(w2_ref[...].astype(jnp.float32), h,
                preferred_element_type=jnp.float32)       # (C, 1)
    g = jax.nn.sigmoid(g)

    # Scale: per-channel gate broadcast over the spatial axis.
    o_ref[0] = (x * g).astype(o_ref.dtype)


def se_module(x, w1, w2):
    """Pallas SEModule.forward.

    x  : (N, C, H, W)   NCHW activation (same layout as PyTorch).
    w1 : (C//r, C)      fc1 1x1-conv weight (PyTorch weight squeezed over kH,kW).
    w2 : (C, C//r)      fc2 1x1-conv weight.
    """
    n, c, h, w = x.shape
    c_red = w1.shape[0]
    assert w1.shape == (c_red, c) and w2.shape == (c, c_red)
    hw = h * w

    # Free reshape: keeps NCHW memory order, puts H*W on the 128-lane axis.
    x2 = x.reshape(n, c, hw)

    out = pl.pallas_call(
        _se_kernel,
        out_shape=jax.ShapeDtypeStruct((n, c, hw), x.dtype),
        grid=(n,),
        in_specs=[
            pl.BlockSpec((1, c, hw), lambda i: (i, 0, 0)),   # one full sample
            pl.BlockSpec((c_red, c), lambda i: (0, 0)),      # fc1 weight (resident)
            pl.BlockSpec((c, c_red), lambda i: (0, 0)),      # fc2 weight (resident)
        ],
        out_specs=pl.BlockSpec((1, c, hw), lambda i: (i, 0, 0)),
        compiler_params=pltpu.CompilerParams(
            dimension_semantics=("parallel",)),              # megacore over batch
    )(x2, w1, w2)

    return out.reshape(n, c, h, w)


def se_ref(x, w1, w2):
    """Pure-JAX reference mirroring the PyTorch SEModule.forward exactly."""
    m = jnp.mean(x, axis=(2, 3))                 # AdaptiveAvgPool2d(1), squeezed
    h = jnp.maximum(m @ w1.T, 0.0)               # fc1 (1x1 conv, no bias) + ReLU
    g = jax.nn.sigmoid(h @ w2.T)                 # fc2 + Sigmoid
    return x * g[:, :, None, None]               # module_input * x


if __name__ == "__main__":
    key = jax.random.PRNGKey(0)
    kx, k1, k2 = jax.random.split(key, 3)

    N, C, H, W = 2, 4, 16, 16
    reduction = 2
    C_red = C // reduction

    x = jax.random.normal(kx, (N, C, H, W), dtype=jnp.float32)
    # Deterministic stand-ins for the xavier-uniform-initialized conv weights.
    w1 = jax.random.normal(k1, (C_red, C), dtype=jnp.float32) * 0.5
    w2 = jax.random.normal(k2, (C, C_red), dtype=jnp.float32) * 0.5

    out = se_module(x, w1, w2)
    out = jax.block_until_ready(out)
    assert out.shape == (N, C, H, W), out.shape

    ref_out = se_ref(x, w1, w2)
    assert jnp.allclose(out, ref_out, atol=1e-5, rtol=1e-5), "mismatch vs reference"
    print("KERNEL_OK")
</pallas_src>

<mosaic_0001>
module attributes {stable_mosaic.version = 11 : i64} {
  func.func @_se_kernel(%arg0: i32, %arg1: memref<1x4x256xf32, #tpu.memory_space<vmem>>, %arg2: memref<2x4xf32, #tpu.memory_space<vmem>>, %arg3: memref<4x2xf32, #tpu.memory_space<vmem>>, %arg4: memref<1x4x256xf32, #tpu.memory_space<vmem>>) attributes {dimension_semantics = [#tpu.dimension_semantics<parallel>], iteration_bounds = array<i64: 2>, scalar_prefetch = 0 : i64, scratch_operands = 0 : i64, tpu.core_type = #tpu.core_type<tc>, window_params = [{transform_indices = @transform_0, window_bounds = array<i64: 1, 4, 256>}, {pipeline_mode = #tpu.pipeline_mode<synchronous>, transform_indices = @transform_1, window_bounds = array<i64: 2, 4>}, {pipeline_mode = #tpu.pipeline_mode<synchronous>, transform_indices = @transform_2, window_bounds = array<i64: 4, 2>}, {transform_indices = @transform_3, window_bounds = array<i64: 1, 4, 256>}]} {
    %c0 = arith.constant 0 : index
    %c0_0 = arith.constant 0 : index
    %c0_1 = arith.constant 0 : index
    %0 = vector.load %arg1[%c0, %c0_0, %c0_1] : memref<1x4x256xf32, #tpu.memory_space<vmem>>, vector<1x4x256xf32>
    %1 = vector.shape_cast %0 : vector<1x4x256xf32> to vector<4x256xf32>
    %cst = arith.constant dense<0.000000e+00> : vector<4xf32>
    %2 = vector.multi_reduction <add>, %1, %cst [1] : vector<4x256xf32> to vector<4xf32>
    %3 = vector.shape_cast %2 : vector<4xf32> to vector<4x1xf32>
    %cst_2 = arith.constant 3.906250e-03 : f32
    %4 = vector.broadcast %cst_2 : f32 to vector<4x1xf32>
    %5 = arith.mulf %3, %4 : vector<4x1xf32>
    %c0_3 = arith.constant 0 : index
    %c0_4 = arith.constant 0 : index
    %6 = vector.load %arg2[%c0_3, %c0_4] : memref<2x4xf32, #tpu.memory_space<vmem>>, vector<2x4xf32>
    %cst_5 = arith.constant dense<0.000000e+00> : vector<2x1xf32>
    %7 = tpu.matmul %6, %5, %cst_5 {dimension_numbers = #tpu.dot_dimension_numbers<[1], [0], [0], [1], [0, 0, 1, 1], [], []>} : vector<2x4xf32>, vector<4x1xf32>, vector<2x1xf32> -> vector<2x1xf32>
    %cst_6 = arith.constant 0.000000e+00 : f32
    %8 = vector.broadcast %cst_6 : f32 to vector<2x1xf32>
    %9 = arith.maximumf %7, %8 : vector<2x1xf32>
    %c0_7 = arith.constant 0 : index
    %c0_8 = arith.constant 0 : index
    %10 = vector.load %arg3[%c0_7, %c0_8] : memref<4x2xf32, #tpu.memory_space<vmem>>, vector<4x2xf32>
    %cst_9 = arith.constant dense<0.000000e+00> : vector<4x1xf32>
    %11 = tpu.matmul %10, %9, %cst_9 {dimension_numbers = #tpu.dot_dimension_numbers<[1], [0], [0], [1], [0, 0, 1, 1], [], []>} : vector<4x2xf32>, vector<2x1xf32>, vector<4x1xf32> -> vector<4x1xf32>
    %12 = arith.negf %11 : vector<4x1xf32>
    %13 = math.exp %12 : vector<4x1xf32>
    %cst_10 = arith.constant 1.000000e+00 : f32
    %14 = vector.broadcast %cst_10 : f32 to vector<4x1xf32>
    %15 = arith.addf %14, %13 : vector<4x1xf32>
    %16 = arith.divf %14, %15 : vector<4x1xf32>
    %17 = vector.broadcast %16 : vector<4x1xf32> to vector<4x256xf32>
    %18 = arith.mulf %1, %17 : vector<4x256xf32>
    %c0_11 = arith.constant 0 : index
    %c0_12 = arith.constant 0 : index
    %c0_13 = arith.constant 0 : index
    %19 = vector.load %arg4[%c0_11, %c0_12, %c0_13] : memref<1x4x256xf32, #tpu.memory_space<vmem>>, vector<1x4x256xf32>
    %20 = vector.shape_cast %19 : vector<1x4x256xf32> to vector<4x256xf32>
    %21 = vector.shape_cast %18 : vector<4x256xf32> to vector<1x4x256xf32>
    tpu.vector_store %arg4[%c0_11, %c0_12, %c0_13], %21 {strides = array<i32>} : memref<1x4x256xf32, #tpu.memory_space<vmem>>, vector<1x4x256xf32>,
    return
  }
  func.func @transform_0(%arg0: i32) -> (i32, i32, i32) {
    %c0_i32 = arith.constant 0 : i32
    %c0_i32_0 = arith.constant 0 : i32
    %c0_i32_1 = arith.constant 0 : i32
    return %arg0, %c0_i32, %c0_i32_0 : i32, i32, i32
  }
  func.func @transform_1(%arg0: i32) -> (i32, i32) {
    %c0_i32 = arith.constant 0 : i32
    %c0_i32_0 = arith.constant 0 : i32
    %c0_i32_1 = arith.constant 0 : i32
    return %c0_i32, %c0_i32_0 : i32, i32
  }
  func.func @transform_2(%arg0: i32) -> (i32, i32) {
    %c0_i32 = arith.constant 0 : i32
    %c0_i32_0 = arith.constant 0 : i32
    %c0_i32_1 = arith.constant 0 : i32
    return %c0_i32, %c0_i32_0 : i32, i32
  }
  func.func @transform_3(%arg0: i32) -> (i32, i32, i32) {
    %c0_i32 = arith.constant 0 : i32
    %c0_i32_0 = arith.constant 0 : i32
    %c0_i32_1 = arith.constant 0 : i32
    return %arg0, %c0_i32, %c0_i32_0 : i32, i32, i32
  }
}

</mosaic_0001>

<bundles_post_ra>
// kernel: tpu_custom_call.1
= control target key start
LH: loop header
LB: loop body
LE: loop exit
PB: predicated region body
PF: predicated region fallthrough
CT: control target
= control target key end

     0   :  { %8 = vsyncpa [#allocation3], 0  ;;  %s709_s0 = inlined_call_operand.hbm [shape: f32[2,4,256], index: 0, kind: input, shape index: {}]   ;;  %s710_s1 = inlined_call_operand.vmem [shape: f32[2,4], index: 1, kind: input, shape index: {}]   ;;  %s711_s2 = inlined_call_operand.vmem [shape: f32[4,2], index: 2, kind: input, shape index: {}]   ;;  %s712_s3 = inlined_call_operand.hbm [shape: f32[2,4,256], index: 3, kind: output, shape index: {}]  }
   0x1   :  { %10 = vsyncpa [#allocation3 + $0x1], 0 }
   0x2   :  { %11 = vsyncpa [#allocation4], 0 }
   0x3   :  { %13 = vsyncpa [#allocation4 + $0x1], 0  ;;  %s572_s12 = smov 0   ;;  %s574_s13 = smov 0  }
   0x4   :  { %s576_s14 = smov 0   ;;  %s578_s15 = smov 0  }
   0x5 LB: > { %s593_s16 = sadd.s32 4294967295, %s548_s15   ;;  %s378_s17 = sadd.s32 4294967294, %s548_s15   ;;  %s548_s15 = sphi %s578_s15, %s722_s15   ;;  %s544_s14 = sphi %s576_s14, %s721_s14   ;;  %s540_s13 = sphi %s574_s13, %s720_s13   ;;  %s536_s12 = sphi %s572_s12, %s719_s12  }
   0x6   : > { %s597_s18 = sadd.s32 1, %s548_s15   ;;  %s26_s19 = sadd.s32 1, %s544_s14 }
   0x7   : > { %s23_s20 = ssub.s32 %s548_s15, %s597_s18  ;;  %p33_p0 = scmp.ne.s32.totalorder %s544_s14, %s540_s13 }
   0x8   : > { %p24_p1 = scmp.eq.s32.totalorder %s23_s20, 0  ;;  %p34_p2 = scmp.eq.s32.totalorder %s548_s15, 0 }
   0x9   : > { %p39_p3 = scmp.ne.s32.totalorder %s540_s13, %s536_s12  ;;  %p40_p4 = scmp.eq.s32.totalorder %s593_s16, 0 }
   0xa   : > { %s609_s21 = scalar_select %p24_p1, %s544_s14, %s26_s19  }
   0xb   : > { %p611_p5 = por %p34_p2, %p33_p0  ;;  %p615_p6 = por %p40_p4, %p39_p3 }
   0xc   : > { %p105_p7 = scmp.eq.s32.totalorder %s593_s16, 1  ;;  %p111_p8 = scmp.eq.s32.totalorder %s378_s17, 1 }
   0xd   : > { %p411_p10 = scmp.lt.s32.totalorder %s548_s15, 2  ;;  %s137_s26 = sand.u32 1, %s544_s14  }
   0xe   : > { %p622_p11 = por %p105_p7, %p33_p0  ;;  %p626_p12 = por %p111_p8, %p39_p3 }
   0xf   : > { %s397_s27 = sshll.u32 %s548_s15, 3  ;;  %s381_s28 = sshll.u32 %s137_s26, 3 }
  0x10   : > { %s146_s4 = scalar_lea.hbm %s709_s0, %s397_s27  ;;  %s141_s6 = scalar_lea.vmem [#allocation2], %s381_s28 }
  0x11   : > { %s148_s5 = sshll.u32 %s146_s4, 4  ;;  %s150_s7 = sshll.u32 %s141_s6, 4  ;;  %s149_s5 = int_to_ptr.hbm [resolvable:$true] %s148_s5  ;;  %s151_s7 = int_to_ptr.vmem [resolvable:$true] %s150_s7 }
  0x12   : > { %p637_p13 = pnand %p411_p10, %p611_p5  ;;  %p384_p0 = scmp.ge.s32.totalorder %s548_s15, 1 }
  0x13   : > { %p155_p1 = scmp.lt.s32.totalorder %s548_s15, 3  ;;  %s138_s9 = scalar_lea.sflag [#allocation3], %s137_s26 }
  0x14   : > { %s452_s10 = sshra.s32 %s149_s5, 4  ;;  %p456_p3 = pneg %p637_p13  ;;  %s453_s10 = int_to_ptr.hbm [resolvable:$true] %s452_s10 }
  0x15   : > { %s454_s11 = scalar_lea.hbm %s453_s10, 8  ;;  %s459_s20 = scalar_lea.hbm %s709_s0, 16 }
  0x16   : > { %p455_p2 = scmp.ne.s32.totalorder %s453_s10, %s454_s11  ;;  %p460_p5 = scmp.lt.s32.totalorder %s453_s10, %s709_s0 }
  0x17   : > { %p461_p8 = scmp.lt.s32.totalorder %s459_s20, %s454_s11 }
  0x18   : > { %p457_p4 = pnand %p456_p3, %p455_p2 }
  0x19   : > { %p462_p10 = por %p461_p8, %p460_p5 }
  0x1a   : > { %p458_p7 = pneg %p457_p4 }
  0x1c   : > { %p463_p9 = pnand %p462_p10, %p458_p7 }
  0x1e   : > { %466 = shalt.err (!%p463_p9)
}
  0x1f   : > { %406 = dma.hbm_to_vmem [thread:$0]  (!%p637_p13), %s149_s5, 128, %s151_s7, %s138_s9  }
  0x20   : > { %p156_p2 = pnand %p384_p0, %p155_p1 }
  0x21   : > { %s658_s26 = sand.u32 (!%p156_p2), 1, %s540_s13  }
  0x22   : > { %159 = sbr.rel (%p156_p2) target bundleno = 576 (0x240), region = 32  ;;  %s385_s28 = sshll.u32 (!%p156_p2), %s658_s26, 3 }
  0x23   : > { %s162_s29 = scalar_lea.sflag (!%p156_p2), [#allocation3], %s658_s26  ;;  %s165_s30 = scalar_lea.vmem (!%p156_p2), [#allocation2], %s385_s28 }
  0x27   : > { %527 = dma.done.wait (%p615_p6), %s162_s29, 128  }
  0x28   : > { %529 = vsyncadd (%p615_p6), %s162_s29, 4294967168  ;;  %v189_v0 = vld [vmem:[%s165_s30] sm:$0xff]  ;;  %vm196_vm0 = vcmask 1043456   ;;  %v203_v8 = vld [vmem:[%s710_s1] sm:$0x3]  ;;  %vm204_vm1 = vcmask 31744  }
  0x29   : > { %191 = vst [vmem:[#allocation1] ss:$2 sm:$0xff] %v189_v0  ;;  %vm237_vm2 = vcmask 1041408   ;;  %v232_v11 = vld [vmem:[%s711_s2] sm:$0xf]  ;;  %vm233_vm3 = vcmask 15360  }
  0x2a   : > { %v550_v12 = vmov 0   ;;  %v551_v27 = vmov 839922192   ;;  %s398_s7 = sshll.u32 %s593_s16, 3  ;;  %s188_s11 = scalar_lea.vmem [#allocation5], %s385_s28 }
  0x2b   : > { %447 = vset.pattern.permute.xlu0 %v550_v12  ;;  %v285_v28 = vunpack.c.l.s4 %v551_v27  ;;  %s303_s10 = scalar_lea.hbm %s712_s3, %s398_s7  ;;  %s305_s17 = sshll.u32 %s188_s11, 4  ;;  %s306_s17 = int_to_ptr.vmem [resolvable:$true] %s305_s17 }
  0x2c   : > { %s307_s19 = sshll.u32 %s303_s10, 4  ;;  %s292_s20 = scalar_lea.sflag [#allocation4], %s658_s26  ;;  %s308_s19 = int_to_ptr.hbm [resolvable:$true] %s307_s19 }
  0x2d   : > { %v286_v29 = vunpack.c.0.s8 %v285_v28  ;;  %s496_s22 = sshra.s32 %s308_s19, 4  ;;  %s502_s30 = scalar_lea.hbm %s712_s3, 16  ;;  %s497_s22 = int_to_ptr.hbm [resolvable:$true] %s496_s22 }
  0x2e   : > { %s498_s16 = scalar_lea.hbm %s497_s22, 8  ;;  %p503_p0 = scmp.lt.s32.totalorder %s497_s22, %s712_s3 }
  0x2f   : > { %p499_p6 = scmp.ne.s32.totalorder %s497_s22, %s498_s16  ;;  %p504_p1 = scmp.lt.s32.totalorder %s502_s30, %s498_s16 }
  0x30   : > { %v192_v1 = vld.sshfl [vmem:[#allocation1] sm:$0xff pattern:$0x75316420]  ;;  %v193_v2 = vld.sshfl [vmem:[#allocation1 + $0x8] sm:$0xff pattern:$0x75316420] }
  0x31   : > { %v197_v3 = vsel %vm196_vm0, %v192_v1, 0.0  ;;  %v198_v4 = vsel %vm196_vm0, %v193_v2, 0.0  ;;  %p500_p9 = pnand %p499_p6, %p622_p11  ;;  %p505_p3 = por %p504_p1, %p503_p0 }
  0x32   : > { %v199_v5 = vadd.f32 %v198_v4, %v197_v3 }
  0x33   : > { %p501_p13 = pneg %p500_p9 }
  0x34   : > { %200 = vadd.xlane.f32.xlu0 %v199_v5 }
  0x35   : > { %p506_p4 = pnand %p505_p3, %p501_p13 }
  0xa7   : > { %v201_v6 = vpop.xlane.xlu0 %200 }
  0xa8   : > { %v202_v7 = vmul.f32 0.00390625, %v201_v6 }
  0xaa   : > { %387 = vmatpush.msk.msra.mxu0 %vm196_vm0, %v202_v7 }
  0xab   : > { %388 = vmatmul.msk.f32.vlgmr.msra.gmra.mxu0 %vm204_vm1, %v203_v8 }
 0x128   : > { %v228_v9 = vpop.f32.mrf.mxu0 }
 0x129   : > { %v231_v10 = vmax.f32 %v228_v9, 0.0 }
 0x12b   : > { %389 = vmatpush.msk.msra.mxu1 %vm237_vm2, %v231_v10 }
 0x12c   : > { %390 = vmatmul.msk.f32.vlgmr.msra.gmra.mxu1 %vm233_vm3, %v232_v11 }
 0x1a9   : > { %v258_v13 = vpop.f32.mrf.mxu1 }
 0x1aa   : > { %v391_v14 = vmul.f32 -1.442695, %v258_v13 }
 0x1ac   : > { %448 = vpow2.f32 %v391_v14 }
 0x1b2   : > { %v449_v15 = vpop.eup %448 }
 0x1b3   : > { %v264_v16 = vadd.f32 1.0, %v449_v15 }
 0x1b5   : > { %450 = vrcp.f32 %v264_v16  ;;  %v276_v20 = vand.u32 2147483648, %v264_v16  ;;  %v274_v22 = vand.u32 2147483647, %v264_v16  ;;  %vm270_vm5 = vweird.f32 %v264_v16 }
 0x1b7   : > { %v277_v24 = vor.u32 1.1754944e-38, %v276_v20  ;;  %vm275_vm7 = vcmp.eq.f32.partialorder %v274_v22, 8.507059e+37 }
 0x1bb   : > { %v451_v17 = vpop.eup %450 }
 0x1bc   : > { %v266_v18 = vmul.f32 %v451_v17, %v264_v16  ;;  %vm271_vm4 = vweird.f32 %v451_v17 }
 0x1bd   : > { %vm272_vm6 = vmor %vm270_vm5, %vm271_vm4 }
 0x1be   : > { %v267_v19 = vsub.f32 1.0, %v266_v18 }
 0x1c0   : > { %v268_v21 = vmul.f32 %v451_v17, %v267_v19 }
 0x1c2   : > { %v269_v23 = vadd.f32 %v451_v17, %v268_v21 }
 0x1c4   : > { %v273_v25 = vsel %vm272_vm6, %v451_v17, %v269_v23 }
 0x1c5   : > { %v278_v26 = vsel %vm275_vm7, %v277_v24, %v273_v25 }
 0x1c6   : > { %282 = vperm.xlu0 %447, %v278_v26  }
 0x238   : > { %v283_v30 = vpop.permute.xlu0 %282 }
 0x239   : > { %v287_v31 = vperm.slane %v283_v30, %v286_v29 }
 0x23b   : > { %v289_v32 = vmul.f32 %v287_v31, %v189_v0 }
 0x23d   : > { %290 = vst [vmem:[%s188_s11] sm:$0xff] %v289_v32 }
 0x23e   : > { %509 = shalt.err (!%p506_p4)
}
 0x23f   : > { %401 = dma.vmem_to_hbm [thread:$0]  (%p622_p11), %s306_s17, 128, %s308_s19, %s292_s20  }
 0x240 PF: > { %s319_s26 = sand.u32 1, %s536_s12   ;;  %p718_p7 = scmp.ge.s32.totalorder %s548_s15, 2 }
 0x241   : > { %s320_s5 = scalar_lea.sflag [#allocation4], %s319_s26 }
 0x242   : > { %p408_p5 = pnand %p718_p7, %p626_p12 }
 0x244   : > { %p409_p8 = pneg %p408_p5 }
 0x246   : > { %531 = dma.done.wait (%p409_p8), %s320_s5, 128  }
 0x247   : > { %533 = vsyncadd (%p409_p8), %s320_s5, 4294967168  ;;  %p16_p10 = scmp.ge.s32.totalorder %s597_s18, 4   ;;  %s719_s12 = smov %s540_s13 }
 0x248   : > { %s720_s13 = smov %s544_s14  ;;  %s721_s14 = smov %s609_s21 }
 0x249   : > { %s722_s15 = smov %s597_s18  ;;  %18 = sbr.rel (!%p16_p10) target bundleno = 5 (0x5), region = 77 }
 0x24e   :  { %326 = vsyncpa [#allocation3], 1 }
 0x24f   :  { %328 = vsyncpa [#allocation3 + $0x1], 1 }
 0x250   :  { %329 = vsyncpa [#allocation4], 1 }
 0x251   :  { %331 = vsyncpa [#allocation4 + $0x1], 1 }

</bundles_post_ra>
